<compile_context>
chip_gen: v7x
topology: tpu7x:2x2x1
jax: 0.10.0
libtpu: 0.0.40
codegen_flags: <defaults>
</compile_context>

<pallas_src>
import numpy as np
import jax
import jax.numpy as jnp
from jax.experimental import pallas as pl
from jax.experimental.pallas import tpu as pltpu


# ----------------------------------------------------------------------------
# Host-side helpers
# ----------------------------------------------------------------------------
def _interp_matrix_np(in_size, out_size, align_corners=False):
    """PyTorch-exact 1-D bilinear interpolation as a dense (out, in) matrix."""
    M = np.zeros((out_size, in_size), dtype=np.float64)
    for i in range(out_size):
        if align_corners:
            src = 0.0 if out_size == 1 else i * (in_size - 1) / (out_size - 1)
        else:
            src = (i + 0.5) * in_size / out_size - 0.5
            src = max(src, 0.0)               # PyTorch clamps to >= 0
        i0 = min(int(np.floor(src)), in_size - 1)
        i1 = min(i0 + 1, in_size - 1)
        w = src - i0
        M[i, i0] += 1.0 - w
        M[i, i1] += w
    return M


def _round_up(x, m):
    return ((x + m - 1) // m) * m


def _cores_per_chip():
    """Best-effort TensorCore count (v7x has 2 TCs/chip, v5e/v6e have 1)."""
    try:
        kind = jax.devices()[0].device_kind.lower()
    except Exception:
        return 1
    return 2 if ("v7" in kind or "7x" in kind) else 1


# ----------------------------------------------------------------------------
# Fused Pallas kernel: x1 * (x2_flat @ M2^T) * (x3_flat @ M4^T)
# ----------------------------------------------------------------------------
def _seb2_kernel(x1_ref, x2_ref, x3_ref, m2t_ref, m4t_ref, o_ref):
    # x1_ref : (TBC, HW)      m2t : (H2*W2, HW)     m4t : (H4*W4, HW)
    # x2_ref : (TBC, H2*W2)   x3_ref : (TBC, H4*W4)
    up2 = jnp.dot(x2_ref[...], m2t_ref[...],
                  preferred_element_type=jnp.float32)        # (TBC, HW)
    up4 = jnp.dot(x3_ref[...], m4t_ref[...],
                  preferred_element_type=jnp.float32)        # (TBC, HW)
    o_ref[...] = (x1_ref[...] * up2 * up4).astype(o_ref.dtype)


def seb2_forward(x1, x2, x3):
    """x1:[B,C,H,W], x2:[B,C,H/2,W/2], x3:[B,C,H/4,W/4] -> [B,C,H,W] float32."""
    B, C, H, W = x1.shape
    _, _, H2, W2 = x2.shape
    _, _, H4, W4 = x3.shape
    BC, HW, HW2, HW4 = B * C, H * W, H2 * W2, H4 * W4

    # Kronecker bilinear-interpolation matrices (host-side, trace-time consts).
    mh2 = _interp_matrix_np(H2, H)
    mw2 = _interp_matrix_np(W2, W)
    mh4 = _interp_matrix_np(H4, H)
    mw4 = _interp_matrix_np(W4, W)
    m2t = jnp.asarray(np.kron(mh2, mw2).T, dtype=jnp.float32)   # (HW2, HW)
    m4t = jnp.asarray(np.kron(mh4, mw4).T, dtype=jnp.float32)   # (HW4, HW)

    # Flatten spatial dims (free, contiguous reshapes) -> lane-dense 2-D layout.
    x1f = x1.reshape(BC, HW).astype(jnp.float32)
    x2f = x2.reshape(BC, HW2).astype(jnp.float32)
    x3f = x3.reshape(BC, HW4).astype(jnp.float32)

    # --- bc-tile sizing: VMEM budget, generation-aware step count ------------
    bcp8 = _round_up(BC, 8)
    row_bytes = 4 * (HW + HW2 + HW4 + HW)              # x1 + x2 + x3 + out per row
    fixed_bytes = 4 * (HW2 * HW + HW4 * HW)            # interp matrices
    budget = 24 * 2**20                                # safe on v5e/v6e/v7x
    tbc_cap = max(8, ((budget - 2 * fixed_bytes) // (2 * row_bytes)) // 8 * 8)
    want_blocks = 2 if (_cores_per_chip() >= 2 and bcp8 >= 16) else 1
    tbc = min(tbc_cap, _round_up(-(-bcp8 // want_blocks), 8))
    n_blocks = -(-bcp8 // tbc)
    bcp = n_blocks * tbc

    if bcp != BC:
        pad = bcp - BC
        x1f = jnp.pad(x1f, ((0, pad), (0, 0)))
        x2f = jnp.pad(x2f, ((0, pad), (0, 0)))
        x3f = jnp.pad(x3f, ((0, pad), (0, 0)))

    flops = 2 * bcp * HW * (HW2 + HW4) + 2 * bcp * HW
    bytes_accessed = 4 * (bcp * (2 * HW + HW2 + HW4) + HW2 * HW + HW4 * HW)

    out = pl.pallas_call(
        _seb2_kernel,
        out_shape=jax.ShapeDtypeStruct((bcp, HW), jnp.float32),
        grid=(n_blocks,),
        in_specs=[
            pl.BlockSpec((tbc, HW), lambda i: (i, 0)),
            pl.BlockSpec((tbc, HW2), lambda i: (i, 0)),
            pl.BlockSpec((tbc, HW4), lambda i: (i, 0)),
            pl.BlockSpec((HW2, HW), lambda i: (0, 0)),    # constant interp matrices
            pl.BlockSpec((HW4, HW), lambda i: (0, 0)),
        ],
        out_specs=pl.BlockSpec((tbc, HW), lambda i: (i, 0)),
        compiler_params=pltpu.CompilerParams(
            dimension_semantics=("parallel",),
            vmem_limit_bytes=32 * 2**20),
        cost_estimate=pl.CostEstimate(flops=flops, transcendentals=0,
                                      bytes_accessed=bytes_accessed),
    )(x1f, x2f, x3f, m2t, m4t)

    return out[:BC].reshape(B, C, H, W)


# ----------------------------------------------------------------------------
# Demo / self-check
# ----------------------------------------------------------------------------
if __name__ == "__main__":
    key = jax.random.PRNGKey(0)
    B, C, H, W = 2, 8, 32, 32
    k1, k2, k3 = jax.random.split(key, 3)
    x1 = jax.random.normal(k1, (B, C, H, W), jnp.float32)
    x2 = jax.random.normal(k2, (B, C, H // 2, W // 2), jnp.float32)
    x3 = jax.random.normal(k3, (B, C, H // 4, W // 4), jnp.float32)

    out = jax.jit(seb2_forward)(x1, x2, x3)
    jax.block_until_ready(out)
    assert out.shape == (B, C, H, W), out.shape

    # Sanity check against a float64 numpy evaluation of the same math.
    mh2 = _interp_matrix_np(H // 2, H)
    mw2t = _interp_matrix_np(W // 2, W).T
    mh4 = _interp_matrix_np(H // 4, H)
    mw4t = _interp_matrix_np(W // 4, W).T
    x1n = np.asarray(x1, np.float64)
    x2n = np.asarray(x2, np.float64)
    x3n = np.asarray(x3, np.float64)
    up2 = np.einsum('oh,bchw,wx->bcox', mh2, x2n, mw2t)
    up4 = np.einsum('oh,bchw,wx->bcox', mh4, x3n, mw4t)
    ref = x1n * up2 * up4
    err = float(np.max(np.abs(np.asarray(out, np.float64) - ref)))
    assert err < 1e-3, err

    print("KERNEL_OK")
</pallas_src>

<mosaic_0001>
module attributes {stable_mosaic.version = 11 : i64} {
  func.func @_seb2_kernel(%arg0: i32, %arg1: memref<16x1024xf32, #tpu.memory_space<vmem>>, %arg2: memref<16x256xf32, #tpu.memory_space<vmem>>, %arg3: memref<16x64xf32, #tpu.memory_space<vmem>>, %arg4: memref<256x1024xf32, #tpu.memory_space<vmem>>, %arg5: memref<64x1024xf32, #tpu.memory_space<vmem>>, %arg6: memref<16x1024xf32, #tpu.memory_space<vmem>>) attributes {dimension_semantics = [#tpu.dimension_semantics<parallel>], iteration_bounds = array<i64: 1>, scalar_prefetch = 0 : i64, scratch_operands = 0 : i64, tpu.core_type = #tpu.core_type<tc>, window_params = [{transform_indices = @transform_0, window_bounds = array<i64: 16, 1024>}, {transform_indices = @transform_1, window_bounds = array<i64: 16, 256>}, {transform_indices = @transform_2, window_bounds = array<i64: 16, 64>}, {pipeline_mode = #tpu.pipeline_mode<synchronous>, transform_indices = @transform_3, window_bounds = array<i64: 256, 1024>}, {pipeline_mode = #tpu.pipeline_mode<synchronous>, transform_indices = @transform_4, window_bounds = array<i64: 64, 1024>}, {transform_indices = @transform_5, window_bounds = array<i64: 16, 1024>}]} {
    %c0 = arith.constant 0 : index
    %c0_0 = arith.constant 0 : index
    %0 = vector.load %arg2[%c0, %c0_0] : memref<16x256xf32, #tpu.memory_space<vmem>>, vector<16x256xf32>
    %c0_1 = arith.constant 0 : index
    %c0_2 = arith.constant 0 : index
    %1 = vector.load %arg4[%c0_1, %c0_2] : memref<256x1024xf32, #tpu.memory_space<vmem>>, vector<256x1024xf32>
    %cst = arith.constant dense<0.000000e+00> : vector<16x1024xf32>
    %2 = tpu.matmul %0, %1, %cst {dimension_numbers = #tpu.dot_dimension_numbers<[1], [0], [0], [1], [0, 0, 1, 1], [], []>} : vector<16x256xf32>, vector<256x1024xf32>, vector<16x1024xf32> -> vector<16x1024xf32>
    %c0_3 = arith.constant 0 : index
    %c0_4 = arith.constant 0 : index
    %3 = vector.load %arg3[%c0_3, %c0_4] : memref<16x64xf32, #tpu.memory_space<vmem>>, vector<16x64xf32>
    %c0_5 = arith.constant 0 : index
    %c0_6 = arith.constant 0 : index
    %4 = vector.load %arg5[%c0_5, %c0_6] : memref<64x1024xf32, #tpu.memory_space<vmem>>, vector<64x1024xf32>
    %cst_7 = arith.constant dense<0.000000e+00> : vector<16x1024xf32>
    %5 = tpu.matmul %3, %4, %cst_7 {dimension_numbers = #tpu.dot_dimension_numbers<[1], [0], [0], [1], [0, 0, 1, 1], [], []>} : vector<16x64xf32>, vector<64x1024xf32>, vector<16x1024xf32> -> vector<16x1024xf32>
    %c0_8 = arith.constant 0 : index
    %c0_9 = arith.constant 0 : index
    %6 = vector.load %arg1[%c0_8, %c0_9] : memref<16x1024xf32, #tpu.memory_space<vmem>>, vector<16x1024xf32>
    %7 = arith.mulf %6, %2 : vector<16x1024xf32>
    %8 = arith.mulf %7, %5 : vector<16x1024xf32>
    %c0_10 = arith.constant 0 : index
    %c0_11 = arith.constant 0 : index
    %9 = vector.load %arg6[%c0_10, %c0_11] : memref<16x1024xf32, #tpu.memory_space<vmem>>, vector<16x1024xf32>
    tpu.vector_store %arg6[%c0_10, %c0_11], %8 {strides = array<i32>} : memref<16x1024xf32, #tpu.memory_space<vmem>>, vector<16x1024xf32>,
    return
  }
  func.func @transform_0(%arg0: i32) -> (i32, i32) {
    %c0_i32 = arith.constant 0 : i32
    %c0_i32_0 = arith.constant 0 : i32
    return %arg0, %c0_i32 : i32, i32
  }
  func.func @transform_1(%arg0: i32) -> (i32, i32) {
    %c0_i32 = arith.constant 0 : i32
    %c0_i32_0 = arith.constant 0 : i32
    return %arg0, %c0_i32 : i32, i32
  }
  func.func @transform_2(%arg0: i32) -> (i32, i32) {
    %c0_i32 = arith.constant 0 : i32
    %c0_i32_0 = arith.constant 0 : i32
    return %arg0, %c0_i32 : i32, i32
  }
  func.func @transform_3(%arg0: i32) -> (i32, i32) {
    %c0_i32 = arith.constant 0 : i32
    %c0_i32_0 = arith.constant 0 : i32
    %c0_i32_1 = arith.constant 0 : i32
    return %c0_i32, %c0_i32_0 : i32, i32
  }
  func.func @transform_4(%arg0: i32) -> (i32, i32) {
    %c0_i32 = arith.constant 0 : i32
    %c0_i32_0 = arith.constant 0 : i32
    %c0_i32_1 = arith.constant 0 : i32
    return %c0_i32, %c0_i32_0 : i32, i32
  }
  func.func @transform_5(%arg0: i32) -> (i32, i32) {
    %c0_i32 = arith.constant 0 : i32
    %c0_i32_0 = arith.constant 0 : i32
    return %arg0, %c0_i32 : i32, i32
  }
}

</mosaic_0001>

<bundles_post_ra>
// kernel: seb2_forward.1
= control target key start
LH: loop header
LB: loop body
LE: loop exit
PB: predicated region body
PF: predicated region fallthrough
CT: control target
= control target key end

     0   :  { %10 = vsyncpa [#allocation3], 0  ;;  %s1408_s18 = smov [#allocation2]   ;;  %s1818_s0 = inlined_call_operand.vmem [shape: f32[16,1024], index: 0, kind: input, shape index: {}]   ;;  %s1819_s1 = inlined_call_operand.vmem [shape: f32[16,256], index: 1, kind: input, shape index: {}]   ;;  %s1820_s2 = inlined_call_operand.vmem [shape: f32[16,64], index: 2, kind: input, shape index: {}]   ;;  %s1821_s3 = inlined_call_operand.hbm [shape: f32[256,1024], index: 3, kind: input, shape index: {}]   ;;  %s1822_s4 = inlined_call_operand.vmem [shape: f32[64,1024], index: 4, kind: input, shape index: {}]   ;;  %s1823_s5 = inlined_call_operand.vmem [shape: f32[16,1024], index: 5, kind: output, shape index: {}]  }
   0x1   :  { %s22_s19 = sshll.u32 %s1408_s18, 4  ;;  %s1384_s22 = scalar_lea.hbm %s1821_s3, 32768  ;;  %s23_s19 = int_to_ptr.vmem [resolvable:$true] %s22_s19 }
   0x2   :  { %p1385_p0 = scmp.ne.s32.totalorder %s1821_s3, %s1384_s22  ;;  %p1388_p1 = scmp.lt.u32.totalorder %s1384_s22, %s1821_s3 }
   0x4   :  { %p1390_p2 = pnand %p1388_p1, %p1385_p0 }
   0x6   :  { %1393 = shalt.err (!%p1390_p2)
}
   0x7   :  { %s1394_s27 = scalar_lea.vmem %s23_s19, 32768  ;;  %p1399_p4 = scmp.lt.s32.totalorder %s23_s19, %s23_s19 }
   0x8   :  { %p1395_p3 = scmp.ne.s32.totalorder %s23_s19, %s1394_s27  ;;  %p1400_p5 = scmp.lt.s32.totalorder %s1394_s27, %s1394_s27 }
   0xa   :  { %p1401_p6 = por %p1400_p5, %p1399_p4 }
   0xc   :  { %p1402_p7 = pnand %p1401_p6, %p1395_p3 }
   0xe   :  { %1405 = shalt.err (!%p1402_p7)
}
   0xf   :  { %s1409_s28 = smov 1024   ;;  %s1410_s29 = smov 64  }
  0x10   :  { %28 = dma.hbm_to_vmem [thread:$0]  %s1821_s3, 32768, %s23_s19, [#allocation3], %s1409_s28, %s1409_s28, %s1410_s29  }
  0x11   :  { %1406 = dma.done.wait [#allocation3], 32768  }
  0x12   :  { %1407 = vsyncadd [#allocation3], 4294934528  ;;  %v39_v0 = vld [vmem:[#allocation2 + $0x8] sm:$0xff]  ;;  %v41_v2 = vld [vmem:[#allocation2 + $0x18] sm:$0xff]  ;;  %vm668_vm0 = vcmask 523264  }
  0x13   :  { %v47_v1 = vld [vmem:[#allocation2 + $0x48] sm:$0xff]  ;;  %v49_v4 = vld [vmem:[#allocation2 + $0x58] sm:$0xff]  ;;  %v38_v5 = vld [vmem:[#allocation2] sm:$0xff] }
  0x14   :  { %v1060_v3 = vpack.c.bf16 %v47_v1, %v39_v0  ;;  %v46_v6 = vld [vmem:[#allocation2 + $0x40] sm:$0xff]  ;;  %v1124_v7 = vpack.c.bf16 %v49_v4, %v41_v2  ;;  %v40_v9 = vld [vmem:[#allocation2 + $0x10] sm:$0xff]  ;;  %v55_v11 = vld [vmem:[#allocation2 + $0x88] sm:$0xff] }
  0x15   :  { %v1062_v8 = vpack.c.bf16 %v46_v6, %v38_v5  ;;  %v48_v10 = vld [vmem:[#allocation2 + $0x50] sm:$0xff]  ;;  %v63_v13 = vld [vmem:[#allocation2 + $0xc8] sm:$0xff]  ;;  %v57_v14 = vld [vmem:[#allocation2 + $0x98] sm:$0xff] }
  0x16   :  { %1061 = vmatprep.subr.bf16.mxu0 %v1060_v3  ;;  %v1126_v12 = vpack.c.bf16 %v48_v10, %v40_v9  ;;  %v65_v15 = vld [vmem:[#allocation2 + $0xd8] sm:$0xff]  ;;  %1125 = vmatprep.subr.bf16.mxu1 %v1124_v7  ;;  %v1064_v16 = vpack.c.bf16 %v63_v13, %v55_v11  ;;  %v54_v18 = vld [vmem:[#allocation2 + $0x80] sm:$0xff]  ;;  %v56_v20 = vld [vmem:[#allocation2 + $0x90] sm:$0xff] }
  0x17   :  { %1063 = vmatpush1.bf16.msra.mxu0 %v1062_v8  ;;  %v1128_v17 = vpack.c.bf16 %v65_v15, %v57_v14  ;;  %v62_v19 = vld [vmem:[#allocation2 + $0xc0] sm:$0xff]  ;;  %v64_v22 = vld [vmem:[#allocation2 + $0xd0] sm:$0xff]  ;;  %v71_v23 = vld [vmem:[#allocation2 + $0x108] sm:$0xff] }
  0x18   :  { %1127 = vmatpush1.bf16.msra.mxu1 %v1126_v12  ;;  %v1066_v21 = vpack.c.bf16 %v62_v19, %v54_v18  ;;  %v79_v24 = vld [vmem:[#allocation2 + $0x148] sm:$0xff]  ;;  %1065 = vmatprep.subr.bf16.mxu0 %v1064_v16  ;;  %v1130_v25 = vpack.c.bf16 %v64_v22, %v56_v20  ;;  %v73_v27 = vld [vmem:[#allocation2 + $0x118] sm:$0xff]  ;;  %v70_v29 = vld [vmem:[#allocation2 + $0x100] sm:$0xff] }
  0x19   :  { %1129 = vmatprep.subr.bf16.mxu1 %v1128_v17  ;;  %v1068_v26 = vpack.c.bf16 %v79_v24, %v71_v23  ;;  %v81_v28 = vld [vmem:[#allocation2 + $0x158] sm:$0xff]  ;;  %v78_v31 = vld [vmem:[#allocation2 + $0x140] sm:$0xff]  ;;  %v72_v32 = vld [vmem:[#allocation2 + $0x110] sm:$0xff] }
  0x1a   :  { %v1132_v30 = vpack.c.bf16 %v81_v28, %v73_v27  ;;  %v80_v33 = vld [vmem:[#allocation2 + $0x150] sm:$0xff]  ;;  %v1070_v34 = vpack.c.bf16 %v78_v31, %v70_v29  ;;  %v87_v35 = vld [vmem:[#allocation2 + $0x188] sm:$0xff]  ;;  %v89_v37 = vld [vmem:[#allocation2 + $0x198] sm:$0xff] }
  0x1b   :  { %1067 = vmatpush1.bf16.msra.mxu0 %v1066_v21  ;;  %v95_v36 = vld [vmem:[#allocation2 + $0x1c8] sm:$0xff]  ;;  %v1134_v38 = vpack.c.bf16 %v80_v33, %v72_v32  ;;  %v97_v40 = vld [vmem:[#allocation2 + $0x1d8] sm:$0xff]  ;;  %v86_v41 = vld [vmem:[#allocation2 + $0x180] sm:$0xff] }
  0x1c   :  { %1131 = vmatpush1.bf16.msra.mxu1 %v1130_v25  ;;  %1069 = vmatprep.subr.bf16.mxu0 %v1068_v26  ;;  %v1072_v39 = vpack.c.bf16 %v95_v36, %v87_v35  ;;  %v94_v42 = vld [vmem:[#allocation2 + $0x1c0] sm:$0xff]  ;;  %v1136_v43 = vpack.c.bf16 %v97_v40, %v89_v37  ;;  %v88_v44 = vld [vmem:[#allocation2 + $0x190] sm:$0xff]  ;;  %v103_v46 = vld [vmem:[#allocation2 + $0x208] sm:$0xff] }
  0x1d   :  { %1133 = vmatprep.subr.bf16.mxu1 %v1132_v30  ;;  %v96_v45 = vld [vmem:[#allocation2 + $0x1d0] sm:$0xff]  ;;  %v111_v47 = vld [vmem:[#allocation2 + $0x248] sm:$0xff]  ;;  %v105_v48 = vld [vmem:[#allocation2 + $0x218] sm:$0xff]  ;;  %v1074_v50 = vpack.c.bf16 %v94_v42, %v86_v41 }
  0x1e   :  { %v113_v49 = vld [vmem:[#allocation2 + $0x258] sm:$0xff]  ;;  %v1138_v51 = vpack.c.bf16 %v96_v45, %v88_v44  ;;  %v1076_v52 = vpack.c.bf16 %v111_v47, %v103_v46  ;;  %v102_v53 = vld [vmem:[#allocation2 + $0x200] sm:$0xff]  ;;  %v104_v55 = vld [vmem:[#allocation2 + $0x210] sm:$0xff] }
  0x1f   :  { %1071 = vmatpush1.bf16.msra.mxu0 %v1070_v34  ;;  %v110_v54 = vld [vmem:[#allocation2 + $0x240] sm:$0xff]  ;;  %v1140_v56 = vpack.c.bf16 %v113_v49, %v105_v48  ;;  %v112_v57 = vld [vmem:[#allocation2 + $0x250] sm:$0xff]  ;;  %v119_v58 = vld [vmem:[#allocation2 + $0x288] sm:$0xff] }
  0x20   :  { %1135 = vmatpush1.bf16.msra.mxu1 %v1134_v38  ;;  %1073 = vmatprep.subr.bf16.mxu0 %v1072_v39  ;;  %v127_v59 = vld [vmem:[#allocation2 + $0x2c8] sm:$0xff]  ;;  %v121_v60 = vld [vmem:[#allocation2 + $0x298] sm:$0xff]  ;;  %v1078_v62 = vpack.c.bf16 %v110_v54, %v102_v53  ;;  %v1142_v63 = vpack.c.bf16 %v112_v57, %v104_v55  ;;  %v118_v1 = vld [vmem:[#allocation2 + $0x280] sm:$0xff] }
  0x21   :  { %1137 = vmatprep.subr.bf16.mxu1 %v1136_v43  ;;  %v129_v61 = vld [vmem:[#allocation2 + $0x2d8] sm:$0xff]  ;;  %v1080_v0 = vpack.c.bf16 %v127_v59, %v119_v58  ;;  %v126_v2 = vld [vmem:[#allocation2 + $0x2c0] sm:$0xff]  ;;  %v120_v3 = vld [vmem:[#allocation2 + $0x290] sm:$0xff] }
  0x22   :  { %v1144_v4 = vpack.c.bf16 %v129_v61, %v121_v60  ;;  %v128_v5 = vld [vmem:[#allocation2 + $0x2d0] sm:$0xff]  ;;  %v135_v6 = vld [vmem:[#allocation2 + $0x308] sm:$0xff]  ;;  %v137_v8 = vld [vmem:[#allocation2 + $0x318] sm:$0xff]  ;;  %v1082_v10 = vpack.c.bf16 %v126_v2, %v118_v1 }
  0x23   :  { %1075 = vmatpush1.bf16.msra.mxu0 %v1074_v50  ;;  %v143_v7 = vld [vmem:[#allocation2 + $0x348] sm:$0xff]  ;;  %v145_v9 = vld [vmem:[#allocation2 + $0x358] sm:$0xff]  ;;  %v1146_v11 = vpack.c.bf16 %v128_v5, %v120_v3  ;;  %v134_v13 = vld [vmem:[#allocation2 + $0x300] sm:$0xff] }
  0x24   :  { %1139 = vmatpush1.bf16.msra.mxu1 %v1138_v51  ;;  %1077 = vmatprep.subr.bf16.mxu0 %v1076_v52  ;;  %v1084_v12 = vpack.c.bf16 %v143_v7, %v135_v6  ;;  %v142_v14 = vld [vmem:[#allocation2 + $0x340] sm:$0xff]  ;;  %v136_v15 = vld [vmem:[#allocation2 + $0x310] sm:$0xff]  ;;  %v1148_v16 = vpack.c.bf16 %v145_v9, %v137_v8  ;;  %v151_v18 = vld [vmem:[#allocation2 + $0x388] sm:$0xff] }
  0x25   :  { %1141 = vmatprep.subr.bf16.mxu1 %v1140_v56  ;;  %v144_v17 = vld [vmem:[#allocation2 + $0x350] sm:$0xff]  ;;  %v159_v19 = vld [vmem:[#allocation2 + $0x3c8] sm:$0xff]  ;;  %v153_v20 = vld [vmem:[#allocation2 + $0x398] sm:$0xff]  ;;  %v1086_v22 = vpack.c.bf16 %v142_v14, %v134_v13 }
  0x26   :  { %v161_v21 = vld [vmem:[#allocation2 + $0x3d8] sm:$0xff]  ;;  %v1150_v23 = vpack.c.bf16 %v144_v17, %v136_v15  ;;  %v1088_v24 = vpack.c.bf16 %v159_v19, %v151_v18  ;;  %v150_v25 = vld [vmem:[#allocation2 + $0x380] sm:$0xff]  ;;  %v152_v27 = vld [vmem:[#allocation2 + $0x390] sm:$0xff] }
  0x27   :  { %1079 = vmatpush1.bf16.msra.mxu0 %v1078_v62  ;;  %v158_v26 = vld [vmem:[#allocation2 + $0x3c0] sm:$0xff]  ;;  %v1152_v28 = vpack.c.bf16 %v161_v21, %v153_v20  ;;  %v160_v29 = vld [vmem:[#allocation2 + $0x3d0] sm:$0xff]  ;;  %v167_v30 = vld [vmem:[#allocation2 + $0x408] sm:$0xff] }
  0x28   :  { %1143 = vmatpush1.bf16.msra.mxu1 %v1142_v63  ;;  %1081 = vmatprep.subr.bf16.mxu0 %v1080_v0  ;;  %v175_v31 = vld [vmem:[#allocation2 + $0x448] sm:$0xff]  ;;  %v169_v32 = vld [vmem:[#allocation2 + $0x418] sm:$0xff]  ;;  %v1090_v34 = vpack.c.bf16 %v158_v26, %v150_v25  ;;  %v1154_v35 = vpack.c.bf16 %v160_v29, %v152_v27  ;;  %v166_v37 = vld [vmem:[#allocation2 + $0x400] sm:$0xff] }
  0x29   :  { %1145 = vmatprep.subr.bf16.mxu1 %v1144_v4  ;;  %v177_v33 = vld [vmem:[#allocation2 + $0x458] sm:$0xff]  ;;  %v1092_v36 = vpack.c.bf16 %v175_v31, %v167_v30  ;;  %v174_v38 = vld [vmem:[#allocation2 + $0x440] sm:$0xff]  ;;  %v168_v39 = vld [vmem:[#allocation2 + $0x410] sm:$0xff] }
  0x2a   :  { %v1156_v40 = vpack.c.bf16 %v177_v33, %v169_v32  ;;  %v176_v41 = vld [vmem:[#allocation2 + $0x450] sm:$0xff]  ;;  %v183_v42 = vld [vmem:[#allocation2 + $0x488] sm:$0xff]  ;;  %v185_v44 = vld [vmem:[#allocation2 + $0x498] sm:$0xff]  ;;  %v1094_v46 = vpack.c.bf16 %v174_v38, %v166_v37 }
  0x2b   :  { %1083 = vmatpush1.bf16.msra.mxu0 %v1082_v10  ;;  %v191_v43 = vld [vmem:[#allocation2 + $0x4c8] sm:$0xff]  ;;  %v193_v45 = vld [vmem:[#allocation2 + $0x4d8] sm:$0xff]  ;;  %v1158_v47 = vpack.c.bf16 %v176_v41, %v168_v39  ;;  %v182_v49 = vld [vmem:[#allocation2 + $0x480] sm:$0xff] }
  0x2c   :  { %1147 = vmatpush1.bf16.msra.mxu1 %v1146_v11  ;;  %1085 = vmatprep.subr.bf16.mxu0 %v1084_v12  ;;  %v1096_v48 = vpack.c.bf16 %v191_v43, %v183_v42  ;;  %v190_v50 = vld [vmem:[#allocation2 + $0x4c0] sm:$0xff]  ;;  %v184_v51 = vld [vmem:[#allocation2 + $0x490] sm:$0xff]  ;;  %v1160_v52 = vpack.c.bf16 %v193_v45, %v185_v44  ;;  %v199_v54 = vld [vmem:[#allocation2 + $0x508] sm:$0xff] }
  0x2d   :  { %1149 = vmatprep.subr.bf16.mxu1 %v1148_v16  ;;  %v192_v53 = vld [vmem:[#allocation2 + $0x4d0] sm:$0xff]  ;;  %v207_v55 = vld [vmem:[#allocation2 + $0x548] sm:$0xff]  ;;  %v201_v56 = vld [vmem:[#allocation2 + $0x518] sm:$0xff]  ;;  %v1098_v58 = vpack.c.bf16 %v190_v50, %v182_v49 }
  0x2e   :  { %v209_v57 = vld [vmem:[#allocation2 + $0x558] sm:$0xff]  ;;  %v1162_v59 = vpack.c.bf16 %v192_v53, %v184_v51  ;;  %v1100_v60 = vpack.c.bf16 %v207_v55, %v199_v54  ;;  %v198_v61 = vld [vmem:[#allocation2 + $0x500] sm:$0xff]  ;;  %v200_v63 = vld [vmem:[#allocation2 + $0x510] sm:$0xff] }
  0x2f   :  { %1087 = vmatpush1.bf16.msra.mxu0 %v1086_v22  ;;  %v206_v62 = vld [vmem:[#allocation2 + $0x540] sm:$0xff]  ;;  %v1164_v0 = vpack.c.bf16 %v209_v57, %v201_v56  ;;  %v208_v1 = vld [vmem:[#allocation2 + $0x550] sm:$0xff]  ;;  %v215_v2 = vld [vmem:[#allocation2 + $0x588] sm:$0xff] }
  0x30   :  { %1151 = vmatpush1.bf16.msra.mxu1 %v1150_v23  ;;  %1089 = vmatprep.subr.bf16.mxu0 %v1088_v24  ;;  %v223_v3 = vld [vmem:[#allocation2 + $0x5c8] sm:$0xff]  ;;  %v217_v4 = vld [vmem:[#allocation2 + $0x598] sm:$0xff]  ;;  %v1102_v6 = vpack.c.bf16 %v206_v62, %v198_v61  ;;  %v214_v7 = vld [vmem:[#allocation2 + $0x580] sm:$0xff]  ;;  %v1166_v8 = vpack.c.bf16 %v208_v1, %v200_v63 }
  0x31   :  { %1153 = vmatprep.subr.bf16.mxu1 %v1152_v28  ;;  %v225_v5 = vld [vmem:[#allocation2 + $0x5d8] sm:$0xff]  ;;  %v1104_v9 = vpack.c.bf16 %v223_v3, %v215_v2  ;;  %v222_v10 = vld [vmem:[#allocation2 + $0x5c0] sm:$0xff]  ;;  %v216_v11 = vld [vmem:[#allocation2 + $0x590] sm:$0xff] }
  0x32   :  { %v224_v12 = vld [vmem:[#allocation2 + $0x5d0] sm:$0xff]  ;;  %v1168_v13 = vpack.c.bf16 %v225_v5, %v217_v4  ;;  %v231_v14 = vld [vmem:[#allocation2 + $0x608] sm:$0xff]  ;;  %v233_v17 = vld [vmem:[#allocation2 + $0x618] sm:$0xff]  ;;  %v1106_v19 = vpack.c.bf16 %v222_v10, %v214_v7 }
  0x33   :  { %1091 = vmatpush1.bf16.msra.mxu0 %v1090_v34  ;;  %v239_v15 = vld [vmem:[#allocation2 + $0x648] sm:$0xff]  ;;  %v241_v18 = vld [vmem:[#allocation2 + $0x658] sm:$0xff]  ;;  %v1170_v20 = vpack.c.bf16 %v224_v12, %v216_v11  ;;  %v230_v22 = vld [vmem:[#allocation2 + $0x600] sm:$0xff] }
  0x34   :  { %1155 = vmatpush1.bf16.msra.mxu1 %v1154_v35  ;;  %1093 = vmatprep.subr.bf16.mxu0 %v1092_v36  ;;  %v1457_v16 = vld [vmem:[%s1819_s1 + $0x8] sm:$0xff]  ;;  %v1108_v21 = vpack.c.bf16 %v239_v15, %v231_v14  ;;  %v238_v23 = vld [vmem:[#allocation2 + $0x640] sm:$0xff]  ;;  %v232_v24 = vld [vmem:[#allocation2 + $0x610] sm:$0xff]  ;;  %v1172_v25 = vpack.c.bf16 %v241_v18, %v233_v17 }
  0x35   :  { %1157 = vmatprep.subr.bf16.mxu1 %v1156_v40  ;;  %358 = vmatprep.mubr.f32.mxu0 %v1457_v16  ;;  %v240_v26 = vld [vmem:[#allocation2 + $0x650] sm:$0xff]  ;;  %v247_v27 = vld [vmem:[#allocation2 + $0x688] sm:$0xff]  ;;  %v249_v29 = vld [vmem:[#allocation2 + $0x698] sm:$0xff]  ;;  %v1110_v31 = vpack.c.bf16 %v238_v23, %v230_v22 }
  0x36   :  { %435 = vmatprep.mubr.f32.mxu1 %v1457_v16  ;;  %v255_v28 = vld [vmem:[#allocation2 + $0x6c8] sm:$0xff]  ;;  %v257_v30 = vld [vmem:[#allocation2 + $0x6d8] sm:$0xff]  ;;  %v1174_v32 = vpack.c.bf16 %v240_v26, %v232_v24  ;;  %v246_v34 = vld [vmem:[#allocation2 + $0x680] sm:$0xff] }
  0x37   :  { %1095 = vmatpush1.bf16.msra.mxu0 %v1094_v46  ;;  %v1112_v33 = vpack.c.bf16 %v255_v28, %v247_v27  ;;  %v254_v35 = vld [vmem:[#allocation2 + $0x6c0] sm:$0xff]  ;;  %v248_v36 = vld [vmem:[#allocation2 + $0x690] sm:$0xff]  ;;  %v1176_v37 = vpack.c.bf16 %v257_v30, %v249_v29  ;;  %v263_v39 = vld [vmem:[#allocation2 + $0x708] sm:$0xff] }
  0x38   :  { %1159 = vmatpush1.bf16.msra.mxu1 %v1158_v47  ;;  %1097 = vmatprep.subr.bf16.mxu0 %v1096_v48  ;;  %v256_v38 = vld [vmem:[#allocation2 + $0x6d0] sm:$0xff]  ;;  %v271_v40 = vld [vmem:[#allocation2 + $0x748] sm:$0xff]  ;;  %v265_v41 = vld [vmem:[#allocation2 + $0x718] sm:$0xff]  ;;  %v1114_v43 = vpack.c.bf16 %v254_v35, %v246_v34 }
  0x39   :  { %1161 = vmatprep.subr.bf16.mxu1 %v1160_v52  ;;  %v273_v42 = vld [vmem:[#allocation2 + $0x758] sm:$0xff]  ;;  %v1178_v44 = vpack.c.bf16 %v256_v38, %v248_v36  ;;  %v1116_v45 = vpack.c.bf16 %v271_v40, %v263_v39  ;;  %v262_v46 = vld [vmem:[#allocation2 + $0x700] sm:$0xff]  ;;  %v264_v48 = vld [vmem:[#allocation2 + $0x710] sm:$0xff] }
  0x3a   :  { %v270_v47 = vld [vmem:[#allocation2 + $0x740] sm:$0xff]  ;;  %v1180_v49 = vpack.c.bf16 %v273_v42, %v265_v41  ;;  %v272_v50 = vld [vmem:[#allocation2 + $0x750] sm:$0xff]  ;;  %v279_v51 = vld [vmem:[#allocation2 + $0x788] sm:$0xff] }
  0x3b   :  { %1099 = vmatpush1.bf16.msra.mxu0 %v1098_v58  ;;  %v287_v52 = vld [vmem:[#allocation2 + $0x7c8] sm:$0xff]  ;;  %v281_v53 = vld [vmem:[#allocation2 + $0x798] sm:$0xff]  ;;  %v1118_v55 = vpack.c.bf16 %v270_v47, %v262_v46  ;;  %v1182_v56 = vpack.c.bf16 %v272_v50, %v264_v48  ;;  %v278_v58 = vld [vmem:[#allocation2 + $0x780] sm:$0xff] }
  0x3c   :  { %1163 = vmatpush1.bf16.msra.mxu1 %v1162_v59  ;;  %1101 = vmatprep.subr.bf16.mxu0 %v1100_v60  ;;  %v289_v54 = vld [vmem:[#allocation2 + $0x7d8] sm:$0xff]  ;;  %v1120_v57 = vpack.c.bf16 %v287_v52, %v279_v51  ;;  %v286_v59 = vld [vmem:[#allocation2 + $0x7c0] sm:$0xff]  ;;  %v280_v60 = vld [vmem:[#allocation2 + $0x790] sm:$0xff] }
  0x3d   :  { %1165 = vmatprep.subr.bf16.mxu1 %v1164_v0  ;;  %v1184_v61 = vpack.c.bf16 %v289_v54, %v281_v53  ;;  %v288_v62 = vld [vmem:[#allocation2 + $0x7d0] sm:$0xff]  ;;  %v43_v63 = vld [vmem:[#allocation2 + $0x28] sm:$0xff]  ;;  %v45_v1 = vld [vmem:[#allocation2 + $0x38] sm:$0xff]  ;;  %v1122_v3 = vpack.c.bf16 %v286_v59, %v278_v58 }
  0x3e   :  { %v51_v0 = vld [vmem:[#allocation2 + $0x68] sm:$0xff]  ;;  %v53_v2 = vld [vmem:[#allocation2 + $0x78] sm:$0xff]  ;;  %v1186_v4 = vpack.c.bf16 %v288_v62, %v280_v60  ;;  %v50_v7 = vld [vmem:[#allocation2 + $0x60] sm:$0xff] }
  0x3f   :  { %1103 = vmatpush1.bf16.msra.mxu0 %v1102_v6  ;;  %v1188_v5 = vpack.c.bf16 %v51_v0, %v43_v63  ;;  %v42_v6 = vld [vmem:[#allocation2 + $0x20] sm:$0xff]  ;;  %v52_v10 = vld [vmem:[#allocation2 + $0x70] sm:$0xff]  ;;  %v59_v11 = vld [vmem:[#allocation2 + $0xa8] sm:$0xff] }
  0x40   :  { %1167 = vmatpush1.bf16.msra.mxu1 %v1166_v8  ;;  %1105 = vmatprep.subr.bf16.mxu0 %v1104_v9  ;;  %v44_v8 = vld [vmem:[#allocation2 + $0x30] sm:$0xff]  ;;  %v1252_v9 = vpack.c.bf16 %v53_v2, %v45_v1  ;;  %v67_v12 = vld [vmem:[#allocation2 + $0xe8] sm:$0xff]  ;;  %v69_v14 = vld [vmem:[#allocation2 + $0xf8] sm:$0xff]  ;;  %v1190_v17 = vpack.c.bf16 %v50_v7, %v42_v6 }
  0x41   :  { %1169 = vmatprep.subr.bf16.mxu1 %v1168_v13  ;;  %v61_v13 = vld [vmem:[#allocation2 + $0xb8] sm:$0xff]  ;;  %v1464_v15 = vld [vmem:[%s1819_s1] sm:$0xff]  ;;  %v1254_v18 = vpack.c.bf16 %v52_v10, %v44_v8  ;;  %v60_v22 = vld [vmem:[#allocation2 + $0xb0] sm:$0xff] }
  0x42   :  { %v1256_v23 = vpack.c.bf16 %v69_v14, %v61_v13  ;;  %v68_v24 = vld [vmem:[#allocation2 + $0xf0] sm:$0xff]  ;;  %v83_v26 = vld [vmem:[#allocation2 + $0x168] sm:$0xff]  ;;  %v77_v27 = vld [vmem:[#allocation2 + $0x138] sm:$0xff] }
  0x43   :  { %1107 = vmatpush1.bf16.msra.mxu0 %v1106_v19  ;;  %v1192_v19 = vpack.c.bf16 %v67_v12, %v59_v11  ;;  %v85_v28 = vld [vmem:[#allocation2 + $0x178] sm:$0xff]  ;;  %v1258_v30 = vpack.c.bf16 %v68_v24, %v60_v22  ;;  %v76_v34 = vld [vmem:[#allocation2 + $0x130] sm:$0xff]  ;;  %v99_v38 = vld [vmem:[#allocation2 + $0x1e8] sm:$0xff] }
  0x44   :  { %1171 = vmatpush1.bf16.msra.mxu1 %v1170_v20  ;;  %1109 = vmatprep.subr.bf16.mxu0 %v1108_v21  ;;  %v58_v20 = vld [vmem:[#allocation2 + $0xa0] sm:$0xff]  ;;  %v1260_v35 = vpack.c.bf16 %v85_v28, %v77_v27  ;;  %v84_v36 = vld [vmem:[#allocation2 + $0x170] sm:$0xff]  ;;  %v93_v39 = vld [vmem:[#allocation2 + $0x1b8] sm:$0xff] }
  0x45   :  { %1173 = vmatprep.subr.bf16.mxu1 %v1172_v25  ;;  %v66_v21 = vld [vmem:[#allocation2 + $0xe0] sm:$0xff]  ;;  %v75_v25 = vld [vmem:[#allocation2 + $0x128] sm:$0xff]  ;;  %v101_v40 = vld [vmem:[#allocation2 + $0x1f8] sm:$0xff]  ;;  %v1262_v42 = vpack.c.bf16 %v84_v36, %v76_v34 }
  0x46   :  { %v1194_v29 = vpack.c.bf16 %v66_v21, %v58_v20  ;;  %v92_v46 = vld [vmem:[#allocation2 + $0x1b0] sm:$0xff]  ;;  %v1264_v47 = vpack.c.bf16 %v101_v40, %v93_v39  ;;  %v115_v50 = vld [vmem:[#allocation2 + $0x268] sm:$0xff]  ;;  %v109_v51 = vld [vmem:[#allocation2 + $0x238] sm:$0xff] }
  0x47   :  { %1111 = vmatpush1.bf16.msra.mxu0 %v1110_v31  ;;  %v1196_v31 = vpack.c.bf16 %v83_v26, %v75_v25  ;;  %v100_v48 = vld [vmem:[#allocation2 + $0x1f0] sm:$0xff]  ;;  %v117_v52 = vld [vmem:[#allocation2 + $0x278] sm:$0xff]  ;;  %v131_v62 = vld [vmem:[#allocation2 + $0x2e8] sm:$0xff] }
  0x48   :  { %1175 = vmatpush1.bf16.msra.mxu1 %v1174_v32  ;;  %1113 = vmatprep.subr.bf16.mxu0 %v1112_v33  ;;  %v74_v32 = vld [vmem:[#allocation2 + $0x120] sm:$0xff]  ;;  %v1266_v54 = vpack.c.bf16 %v100_v48, %v92_v46  ;;  %v108_v58 = vld [vmem:[#allocation2 + $0x230] sm:$0xff]  ;;  %v1268_v59 = vpack.c.bf16 %v117_v52, %v109_v51  ;;  %v125_v63 = vld [vmem:[#allocation2 + $0x2b8] sm:$0xff] }
  0x49   :  { %1177 = vmatprep.subr.bf16.mxu1 %v1176_v37  ;;  %v82_v33 = vld [vmem:[#allocation2 + $0x160] sm:$0xff]  ;;  %v91_v37 = vld [vmem:[#allocation2 + $0x1a8] sm:$0xff]  ;;  %v116_v60 = vld [vmem:[#allocation2 + $0x270] sm:$0xff] }
  0x4a   :  { %v1198_v41 = vpack.c.bf16 %v82_v33, %v74_v32  ;;  %v133_v0 = vld [vmem:[#allocation2 + $0x2f8] sm:$0xff]  ;;  %v1270_v2 = vpack.c.bf16 %v116_v60, %v108_v58  ;;  %v124_v6 = vld [vmem:[#allocation2 + $0x2b0] sm:$0xff]  ;;  %v147_v10 = vld [vmem:[#allocation2 + $0x368] sm:$0xff] }
  0x4b   :  { %1115 = vmatpush1.bf16.msra.mxu0 %v1114_v43  ;;  %v1200_v43 = vpack.c.bf16 %v99_v38, %v91_v37  ;;  %v1272_v7 = vpack.c.bf16 %v133_v0, %v125_v63  ;;  %v132_v8 = vld [vmem:[#allocation2 + $0x2f0] sm:$0xff]  ;;  %v141_v11 = vld [vmem:[#allocation2 + $0x338] sm:$0xff]  ;;  %v138_v20 = vld [vmem:[#allocation2 + $0x320] sm:$0xff] }
  0x4c   :  { %1179 = vmatpush1.bf16.msra.mxu1 %v1178_v44  ;;  %1117 = vmatprep.subr.bf16.mxu0 %v1116_v45  ;;  %v90_v44 = vld [vmem:[#allocation2 + $0x1a0] sm:$0xff]  ;;  %v149_v12 = vld [vmem:[#allocation2 + $0x378] sm:$0xff]  ;;  %v140_v22 = vld [vmem:[#allocation2 + $0x330] sm:$0xff] }
  0x4d   :  { %1181 = vmatprep.subr.bf16.mxu1 %v1180_v49  ;;  %v98_v45 = vld [vmem:[#allocation2 + $0x1e0] sm:$0xff]  ;;  %v107_v49 = vld [vmem:[#allocation2 + $0x228] sm:$0xff]  ;;  %v1471_v13 = vld [vmem:[%s1819_s1 + $0x18] sm:$0xff] }
  0x4e   :  { %v1202_v53 = vpack.c.bf16 %v98_v45, %v90_v44  ;;  %v146_v21 = vld [vmem:[#allocation2 + $0x360] sm:$0xff]  ;;  %v148_v24 = vld [vmem:[#allocation2 + $0x370] sm:$0xff]  ;;  %v155_v25 = vld [vmem:[#allocation2 + $0x3a8] sm:$0xff] }
  0x4f   :  { %1119 = vmatpush1.bf16.msra.mxu0 %v1118_v55  ;;  %v1204_v55 = vpack.c.bf16 %v115_v50, %v107_v49  ;;  %v163_v26 = vld [vmem:[#allocation2 + $0x3e8] sm:$0xff]  ;;  %v157_v27 = vld [vmem:[#allocation2 + $0x3b8] sm:$0xff]  ;;  %v154_v32 = vld [vmem:[#allocation2 + $0x3a0] sm:$0xff] }
  0x50   :  { %1183 = vmatpush1.bf16.msra.mxu1 %v1182_v56  ;;  %1121 = vmatprep.subr.bf16.mxu0 %v1120_v57  ;;  %v106_v56 = vld [vmem:[#allocation2 + $0x220] sm:$0xff]  ;;  %v165_v28 = vld [vmem:[#allocation2 + $0x3f8] sm:$0xff]  ;;  %v156_v34 = vld [vmem:[#allocation2 + $0x3b0] sm:$0xff] }
  0x51   :  { %1185 = vmatprep.subr.bf16.mxu1 %v1184_v61  ;;  %v114_v57 = vld [vmem:[#allocation2 + $0x260] sm:$0xff]  ;;  %v123_v61 = vld [vmem:[#allocation2 + $0x2a8] sm:$0xff]  ;;  %v164_v36 = vld [vmem:[#allocation2 + $0x3f0] sm:$0xff] }
  0x52   :  { %v1206_v1 = vpack.c.bf16 %v114_v57, %v106_v56  ;;  %v162_v33 = vld [vmem:[#allocation2 + $0x3e0] sm:$0xff]  ;;  %v171_v37 = vld [vmem:[#allocation2 + $0x428] sm:$0xff]  ;;  %v173_v39 = vld [vmem:[#allocation2 + $0x438] sm:$0xff] }
  0x53   :  { %1123 = vmatpush1.bf16.msra.mxu0 %v1122_v3  ;;  %v1208_v3 = vpack.c.bf16 %v131_v62, %v123_v61  ;;  %v179_v38 = vld [vmem:[#allocation2 + $0x468] sm:$0xff]  ;;  %v181_v40 = vld [vmem:[#allocation2 + $0x478] sm:$0xff]  ;;  %v170_v44 = vld [vmem:[#allocation2 + $0x420] sm:$0xff] }
  0x54   :  { %1187 = vmatpush1.bf16.msra.mxu1 %v1186_v4  ;;  %1189 = vmatprep.subr.bf16.mxu0 %v1188_v5  ;;  %v122_v4 = vld [vmem:[#allocation2 + $0x2a0] sm:$0xff]  ;;  %v172_v46 = vld [vmem:[#allocation2 + $0x430] sm:$0xff]  ;;  %v187_v49 = vld [vmem:[#allocation2 + $0x4a8] sm:$0xff] }
  0x55   :  { %1253 = vmatprep.subr.bf16.mxu1 %v1252_v9  ;;  %v130_v5 = vld [vmem:[#allocation2 + $0x2e0] sm:$0xff]  ;;  %v139_v9 = vld [vmem:[#allocation2 + $0x328] sm:$0xff]  ;;  %v180_v48 = vld [vmem:[#allocation2 + $0x470] sm:$0xff] }
  0x56   :  { %359 = vmatmul.mubr.f32.vlgmr.msra.gmra.mrb[0].mxu0 %v1464_v15  ;;  %v1210_v14 = vpack.c.bf16 %v130_v5, %v122_v4  ;;  %v178_v45 = vld [vmem:[#allocation2 + $0x460] sm:$0xff]  ;;  %v195_v50 = vld [vmem:[#allocation2 + $0x4e8] sm:$0xff]  ;;  %v189_v51 = vld [vmem:[#allocation2 + $0x4b8] sm:$0xff] }
  0x57   :  { %436 = vmatmul.mubr.f32.vlgmr.msra.gmra.mrb[0].mxu1 %v1464_v15  ;;  %1191 = vmatpush1.bf16.msra.mxu0 %v1190_v17  ;;  %v1477_v17 = vld [vmem:[%s1819_s1 + $0x10] sm:$0xff]  ;;  %v197_v52 = vld [vmem:[#allocation2 + $0x4f8] sm:$0xff]  ;;  %v194_v56 = vld [vmem:[#allocation2 + $0x4e0] sm:$0xff] }
  0x58   :  { %1255 = vmatpush1.bf16.msra.mxu1 %v1254_v18  ;;  %1193 = vmatprep.subr.bf16.mxu0 %v1192_v19  ;;  %v1274_v18 = vpack.c.bf16 %v132_v8, %v124_v6  ;;  %v1212_v19 = vpack.c.bf16 %v147_v10, %v139_v9  ;;  %v188_v57 = vld [vmem:[#allocation2 + $0x4b0] sm:$0xff]  ;;  %v1288_v58 = vpack.c.bf16 %v197_v52, %v189_v51  ;;  %v203_v60 = vld [vmem:[#allocation2 + $0x528] sm:$0xff]  ;;  %v205_v62 = vld [vmem:[#allocation2 + $0x538] sm:$0xff] }
  0x59   :  { %1257 = vmatprep.subr.bf16.mxu1 %v1256_v23  ;;  %364 = vmatprep.mubr.f32.mxu0 %v1471_v13  ;;  %v1276_v23 = vpack.c.bf16 %v149_v12, %v141_v11  ;;  %v211_v61 = vld [vmem:[#allocation2 + $0x568] sm:$0xff]  ;;  %v213_v63 = vld [vmem:[#allocation2 + $0x578] sm:$0xff]  ;;  %v210_v4 = vld [vmem:[#allocation2 + $0x560] sm:$0xff] }
  0x5a   :  { %441 = vmatprep.mubr.f32.mxu1 %v1471_v13  ;;  %365 = vmatmul.mubr.f32.gmra.mrb[2].mxu0 %v1477_v17  ;;  %v204_v5 = vld [vmem:[#allocation2 + $0x530] sm:$0xff]  ;;  %v1292_v6 = vpack.c.bf16 %v213_v63, %v205_v62  ;;  %v219_v8 = vld [vmem:[#allocation2 + $0x5a8] sm:$0xff]  ;;  %v221_v10 = vld [vmem:[#allocation2 + $0x5b8] sm:$0xff] }
  0x5b   :  { %1195 = vmatpush1.bf16.msra.mxu0 %v1194_v29  ;;  %442 = vmatmul.mubr.f32.gmra.mrb[2].mxu1 %v1477_v17  ;;  %v1214_v29 = vpack.c.bf16 %v146_v21, %v138_v20  ;;  %v227_v9 = vld [vmem:[#allocation2 + $0x5e8] sm:$0xff]  ;;  %v229_v11 = vld [vmem:[#allocation2 + $0x5f8] sm:$0xff]  ;;  %v226_v20 = vld [vmem:[#allocation2 + $0x5e0] sm:$0xff] }
  0x5c   :  { %1259 = vmatpush1.bf16.msra.mxu1 %v1258_v30  ;;  %1197 = vmatprep.subr.bf16.mxu0 %v1196_v31  ;;  %v1278_v30 = vpack.c.bf16 %v148_v24, %v140_v22  ;;  %v1216_v31 = vpack.c.bf16 %v163_v26, %v155_v25  ;;  %v220_v21 = vld [vmem:[#allocation2 + $0x5b0] sm:$0xff]  ;;  %v1296_v22 = vpack.c.bf16 %v229_v11, %v221_v10  ;;  %v235_v24 = vld [vmem:[#allocation2 + $0x628] sm:$0xff]  ;;  %v237_v26 = vld [vmem:[#allocation2 + $0x638] sm:$0xff] }
  0x5d   :  { %1261 = vmatprep.subr.bf16.mxu1 %v1260_v35  ;;  %512 = vmatprep.mubr.f32.mxu0 %v1457_v16  ;;  %v1280_v35 = vpack.c.bf16 %v165_v28, %v157_v27  ;;  %v243_v25 = vld [vmem:[#allocation2 + $0x668] sm:$0xff]  ;;  %v245_v27 = vld [vmem:[#allocation2 + $0x678] sm:$0xff] }
  0x5e   :  { %589 = vmatprep.mubr.f32.mxu1 %v1457_v16  ;;  %v1222_v16 = vpack.c.bf16 %v178_v45, %v170_v44  ;;  %v258_v44 = vld [vmem:[#allocation2 + $0x6e0] sm:$0xff]  ;;  %v252_v45 = vld [vmem:[#allocation2 + $0x6b0] sm:$0xff]  ;;  %v277_v51 = vld [vmem:[#allocation2 + $0x778] sm:$0xff] }
  0x5f   :  { %1199 = vmatpush1.bf16.msra.mxu0 %v1198_v41  ;;  %v1218_v41 = vpack.c.bf16 %v162_v33, %v154_v32  ;;  %v242_v32 = vld [vmem:[#allocation2 + $0x660] sm:$0xff]  ;;  %v236_v33 = vld [vmem:[#allocation2 + $0x630] sm:$0xff]  ;;  %v293_v62 = vld [vmem:[#allocation2 + $0x7f8] sm:$0xff] }
  0x60   :  { %1263 = vmatpush1.bf16.msra.mxu1 %v1262_v42  ;;  %1201 = vmatprep.subr.bf16.mxu0 %v1200_v43  ;;  %v1282_v42 = vpack.c.bf16 %v164_v36, %v156_v34  ;;  %v1220_v43 = vpack.c.bf16 %v179_v38, %v171_v37  ;;  %v1300_v34 = vpack.c.bf16 %v245_v27, %v237_v26  ;;  %v251_v36 = vld [vmem:[#allocation2 + $0x6a8] sm:$0xff]  ;;  %v253_v38 = vld [vmem:[#allocation2 + $0x6b8] sm:$0xff] }
  0x61   :  { %1265 = vmatprep.subr.bf16.mxu1 %v1264_v47  ;;  %v1284_v47 = vpack.c.bf16 %v181_v40, %v173_v39  ;;  %v259_v37 = vld [vmem:[#allocation2 + $0x6e8] sm:$0xff]  ;;  %v261_v39 = vld [vmem:[#allocation2 + $0x6f8] sm:$0xff] }
  0x62   :  { %v615_v10 = vld [vmem:[%s1822_s4 + $0x58] sm:$0xff] }
  0x63   :  { %1203 = vmatpush1.bf16.msra.mxu0 %v1202_v53  ;;  %v1286_v53 = vpack.c.bf16 %v180_v48, %v172_v46  ;;  %v1304_v46 = vpack.c.bf16 %v261_v39, %v253_v38  ;;  %v267_v48 = vld [vmem:[#allocation2 + $0x728] sm:$0xff]  ;;  %v631_v26 = vld [vmem:[%s1822_s4 + $0xd8] sm:$0xff] }
  0x64   :  { %1267 = vmatpush1.bf16.msra.mxu1 %v1266_v54  ;;  %1205 = vmatprep.subr.bf16.mxu0 %v1204_v55  ;;  %v1224_v54 = vpack.c.bf16 %v195_v50, %v187_v49  ;;  %v186_v55 = vld [vmem:[#allocation2 + $0x4a0] sm:$0xff]  ;;  %v275_v49 = vld [vmem:[#allocation2 + $0x768] sm:$0xff]  ;;  %v269_v50 = vld [vmem:[#allocation2 + $0x738] sm:$0xff] }
  0x65   :  { %1269 = vmatprep.subr.bf16.mxu1 %v1268_v59  ;;  %v196_v59 = vld [vmem:[#allocation2 + $0x4f0] sm:$0xff]  ;;  %v1226_v0 = vpack.c.bf16 %v194_v56, %v186_v55  ;;  %v274_v55 = vld [vmem:[#allocation2 + $0x760] sm:$0xff]  ;;  %v647_v38 = vld [vmem:[%s1822_s4 + $0x158] sm:$0xff] }
  0x66   :  { %v268_v56 = vld [vmem:[#allocation2 + $0x730] sm:$0xff] }
  0x67   :  { %1207 = vmatpush1.bf16.msra.mxu0 %v1206_v1  ;;  %v1290_v1 = vpack.c.bf16 %v196_v59, %v188_v57  ;;  %v1308_v57 = vpack.c.bf16 %v277_v51, %v269_v50  ;;  %v283_v59 = vld [vmem:[#allocation2 + $0x7a8] sm:$0xff] }
  0x68   :  { %1271 = vmatpush1.bf16.msra.mxu1 %v1270_v2  ;;  %1209 = vmatprep.subr.bf16.mxu0 %v1208_v3  ;;  %v1228_v2 = vpack.c.bf16 %v211_v61, %v203_v60  ;;  %v202_v3 = vld [vmem:[#allocation2 + $0x520] sm:$0xff]  ;;  %v291_v60 = vld [vmem:[#allocation2 + $0x7e8] sm:$0xff]  ;;  %v285_v61 = vld [vmem:[#allocation2 + $0x7b8] sm:$0xff] }
  0x69   :  { %1273 = vmatprep.subr.bf16.mxu1 %v1272_v7  ;;  %v212_v7 = vld [vmem:[#allocation2 + $0x570] sm:$0xff]  ;;  %v1230_v12 = vpack.c.bf16 %v210_v4, %v202_v3  ;;  %v290_v3 = vld [vmem:[#allocation2 + $0x7e0] sm:$0xff] }
  0x6a   :  { %v284_v4 = vld [vmem:[#allocation2 + $0x7b0] sm:$0xff] }
  0x6b   :  { %1211 = vmatpush1.bf16.msra.mxu0 %v1210_v14  ;;  %v1294_v14 = vpack.c.bf16 %v212_v7, %v204_v5  ;;  %v1312_v5 = vpack.c.bf16 %v293_v62, %v285_v61  ;;  %v605_v7 = vld [vmem:[%s1822_s4 + $0x8] sm:$0xff] }
  0x6c   :  { %1275 = vmatpush1.bf16.msra.mxu1 %v1274_v18  ;;  %1213 = vmatprep.subr.bf16.mxu0 %v1212_v19  ;;  %v1232_v18 = vpack.c.bf16 %v227_v9, %v219_v8  ;;  %v218_v19 = vld [vmem:[#allocation2 + $0x5a0] sm:$0xff]  ;;  %v613_v8 = vld [vmem:[%s1822_s4 + $0x48] sm:$0xff]  ;;  %v607_v9 = vld [vmem:[%s1822_s4 + $0x18] sm:$0xff] }
  0x6d   :  { %1277 = vmatprep.subr.bf16.mxu1 %v1276_v23  ;;  %v228_v23 = vld [vmem:[#allocation2 + $0x5f0] sm:$0xff]  ;;  %v1234_v28 = vpack.c.bf16 %v226_v20, %v218_v19  ;;  %v612_v19 = vld [vmem:[%s1822_s4 + $0x40] sm:$0xff] }
  0x6e   :  { %v606_v20 = vld [vmem:[%s1822_s4 + $0x10] sm:$0xff] }
  0x6f   :  { %1215 = vmatpush1.bf16.msra.mxu0 %v1214_v29  ;;  %v1298_v29 = vpack.c.bf16 %v228_v23, %v220_v21  ;;  %v1332_v21 = vpack.c.bf16 %v615_v10, %v607_v9  ;;  %v621_v23 = vld [vmem:[%s1822_s4 + $0x88] sm:$0xff]  ;;  %v635_v9 = vld [vmem:[%s1822_s4 + $0xf8] sm:$0xff] }
  0x70   :  { %1279 = vmatpush1.bf16.msra.mxu1 %v1278_v30  ;;  %1217 = vmatprep.subr.bf16.mxu0 %v1216_v31  ;;  %v1236_v30 = vpack.c.bf16 %v243_v25, %v235_v24  ;;  %v234_v31 = vld [vmem:[#allocation2 + $0x620] sm:$0xff]  ;;  %v629_v24 = vld [vmem:[%s1822_s4 + $0xc8] sm:$0xff]  ;;  %v623_v25 = vld [vmem:[%s1822_s4 + $0x98] sm:$0xff] }
  0x71   :  { %1281 = vmatprep.subr.bf16.mxu1 %v1280_v35  ;;  %v244_v35 = vld [vmem:[#allocation2 + $0x670] sm:$0xff]  ;;  %v1238_v40 = vpack.c.bf16 %v242_v32, %v234_v31  ;;  %v628_v31 = vld [vmem:[%s1822_s4 + $0xc0] sm:$0xff] }
  0x72   :  { %v622_v32 = vld [vmem:[%s1822_s4 + $0x90] sm:$0xff] }
  0x73   :  { %1219 = vmatpush1.bf16.msra.mxu0 %v1218_v41  ;;  %v1302_v41 = vpack.c.bf16 %v244_v35, %v236_v33  ;;  %v1336_v33 = vpack.c.bf16 %v631_v26, %v623_v25  ;;  %v637_v35 = vld [vmem:[%s1822_s4 + $0x108] sm:$0xff] }
  0x74   :  { %1283 = vmatpush1.bf16.msra.mxu1 %v1282_v42  ;;  %1221 = vmatprep.subr.bf16.mxu0 %v1220_v43  ;;  %v1240_v42 = vpack.c.bf16 %v259_v37, %v251_v36  ;;  %v250_v43 = vld [vmem:[#allocation2 + $0x6a0] sm:$0xff]  ;;  %v645_v36 = vld [vmem:[%s1822_s4 + $0x148] sm:$0xff]  ;;  %v639_v37 = vld [vmem:[%s1822_s4 + $0x118] sm:$0xff] }
  0x75   :  { %1285 = vmatprep.subr.bf16.mxu1 %v1284_v47  ;;  %v260_v47 = vld [vmem:[#allocation2 + $0x6f0] sm:$0xff]  ;;  %v1242_v52 = vpack.c.bf16 %v258_v44, %v250_v43  ;;  %v644_v43 = vld [vmem:[%s1822_s4 + $0x140] sm:$0xff]  ;;  %v603_v25 = vld [vmem:[%s1820_s2 + $0x8] sm:$0xff] }
  0x76   :  { %v638_v44 = vld [vmem:[%s1822_s4 + $0x110] sm:$0xff] }
  0x77   :  { %1223 = vmatpush1.bf16.msra.mxu0 %v1222_v16  ;;  %v1306_v16 = vpack.c.bf16 %v260_v47, %v252_v45  ;;  %v646_v45 = vld [vmem:[%s1822_s4 + $0x150] sm:$0xff]  ;;  %v661_v47 = vld [vmem:[%s1822_s4 + $0x1c8] sm:$0xff] }
  0x78   :  { %1287 = vmatpush1.bf16.msra.mxu1 %v1286_v53  ;;  %1225 = vmatprep.subr.bf16.mxu0 %v1224_v54  ;;  %v1244_v53 = vpack.c.bf16 %v275_v49, %v267_v48  ;;  %v266_v54 = vld [vmem:[#allocation2 + $0x720] sm:$0xff]  ;;  %v655_v48 = vld [vmem:[%s1822_s4 + $0x198] sm:$0xff]  ;;  %v1342_v51 = vpack.c.bf16 %v646_v45, %v638_v44  ;;  %v658_v44 = vld [vmem:[%s1822_s4 + $0x1b0] sm:$0xff] }
  0x79   :  { %1289 = vmatprep.subr.bf16.mxu1 %v1288_v58  ;;  %v276_v58 = vld [vmem:[#allocation2 + $0x770] sm:$0xff]  ;;  %v1246_v63 = vpack.c.bf16 %v274_v55, %v266_v54  ;;  %v663_v49 = vld [vmem:[%s1822_s4 + $0x1d8] sm:$0xff]  ;;  %v1411_v55 = vmov 0.0  }
  0x7a   :  { %v1344_v54 = vpack.c.bf16 %v663_v49, %v655_v48 }
  0x7b   :  { %1227 = vmatpush1.bf16.msra.mxu0 %v1226_v0  ;;  %v1310_v0 = vpack.c.bf16 %v276_v58, %v268_v56  ;;  %v609_v56 = vld [vmem:[%s1822_s4 + $0x28] sm:$0xff]  ;;  %v611_v58 = vld [vmem:[%s1822_s4 + $0x38] sm:$0xff] }
  0x7c   :  { %1291 = vmatpush1.bf16.msra.mxu1 %v1290_v1  ;;  %1229 = vmatprep.subr.bf16.mxu0 %v1228_v2  ;;  %v1248_v1 = vpack.c.bf16 %v291_v60, %v283_v59  ;;  %v282_v2 = vld [vmem:[#allocation2 + $0x7a0] sm:$0xff]  ;;  %v619_v59 = vld [vmem:[%s1822_s4 + $0x78] sm:$0xff] }
  0x7d   :  { %1293 = vmatprep.subr.bf16.mxu1 %v1292_v6  ;;  %v292_v6 = vld [vmem:[#allocation2 + $0x7f0] sm:$0xff]  ;;  %v1250_v11 = vpack.c.bf16 %v290_v3, %v282_v2 }
  0x7e   :  { %v610_v2 = vld [vmem:[%s1822_s4 + $0x30] sm:$0xff] }
  0x7f   :  { %1231 = vmatpush1.bf16.msra.mxu0 %v1230_v12  ;;  %v1314_v12 = vpack.c.bf16 %v292_v6, %v284_v4  ;;  %v618_v3 = vld [vmem:[%s1822_s4 + $0x70] sm:$0xff]  ;;  %v625_v4 = vld [vmem:[%s1822_s4 + $0xa8] sm:$0xff]  ;;  %v1621_v6 = vld [vmem:[%s1820_s2] sm:$0xff] }
  0x80   :  { %1295 = vmatpush1.bf16.msra.mxu1 %v1294_v14  ;;  %1233 = vmatprep.subr.bf16.mxu0 %v1232_v18  ;;  %v1316_v14 = vpack.c.bf16 %v613_v8, %v605_v7  ;;  %v604_v18 = vld [vmem:[%s1822_s4] sm:$0xff]  ;;  %v627_v8 = vld [vmem:[%s1822_s4 + $0xb8] sm:$0xff]  ;;  %v1366_v10 = vpack.c.bf16 %v618_v3, %v610_v2 }
  0x81   :  { %1297 = vmatprep.subr.bf16.mxu1 %v1296_v22  ;;  %v614_v22 = vld [vmem:[%s1822_s4 + $0x50] sm:$0xff]  ;;  %v1318_v27 = vpack.c.bf16 %v612_v19, %v604_v18  ;;  %v991_v3 = vld [vmem:[%s1818_s0 + $0x40] sm:$0xff] }
  0x82   :  { %v634_v19 = vld [vmem:[%s1822_s4 + $0xf0] sm:$0xff] }
  0x83   :  { %1235 = vmatpush1.bf16.msra.mxu0 %v1234_v28  ;;  %v1334_v28 = vpack.c.bf16 %v614_v22, %v606_v20  ;;  %v641_v20 = vld [vmem:[%s1822_s4 + $0x128] sm:$0xff]  ;;  %v1368_v22 = vpack.c.bf16 %v635_v9, %v627_v8 }
  0x84   :  { %1299 = vmatpush1.bf16.msra.mxu1 %v1298_v29  ;;  %1237 = vmatprep.subr.bf16.mxu0 %v1236_v30  ;;  %v1320_v29 = vpack.c.bf16 %v629_v24, %v621_v23  ;;  %v620_v30 = vld [vmem:[%s1822_s4 + $0x80] sm:$0xff]  ;;  %v643_v23 = vld [vmem:[%s1822_s4 + $0x138] sm:$0xff] }
  0x85   :  { %1301 = vmatprep.subr.bf16.mxu1 %v1300_v34  ;;  %v630_v34 = vld [vmem:[%s1822_s4 + $0xd0] sm:$0xff]  ;;  %v1322_v39 = vpack.c.bf16 %v628_v31, %v620_v30  ;;  %v651_v24 = vld [vmem:[%s1822_s4 + $0x178] sm:$0xff]  ;;  %v648_v30 = vld [vmem:[%s1822_s4 + $0x160] sm:$0xff] }
  0x86   :  { %v642_v31 = vld [vmem:[%s1822_s4 + $0x130] sm:$0xff] }
  0x87   :  { %1239 = vmatpush1.bf16.msra.mxu0 %v1238_v40  ;;  %v1338_v40 = vpack.c.bf16 %v630_v34, %v622_v32  ;;  %v1372_v32 = vpack.c.bf16 %v651_v24, %v643_v23  ;;  %v657_v34 = vld [vmem:[%s1822_s4 + $0x1a8] sm:$0xff] }
  0x88   :  { %1303 = vmatpush1.bf16.msra.mxu1 %v1302_v41  ;;  %1241 = vmatprep.subr.bf16.mxu0 %v1240_v42  ;;  %v1324_v41 = vpack.c.bf16 %v645_v36, %v637_v35  ;;  %v636_v42 = vld [vmem:[%s1822_s4 + $0x100] sm:$0xff]  ;;  %v665_v35 = vld [vmem:[%s1822_s4 + $0x1e8] sm:$0xff]  ;;  %v659_v36 = vld [vmem:[%s1822_s4 + $0x1b8] sm:$0xff] }
  0x89   :  { %1305 = vmatprep.subr.bf16.mxu1 %v1304_v46  ;;  %v653_v46 = vld [vmem:[%s1822_s4 + $0x188] sm:$0xff]  ;;  %v1326_v50 = vpack.c.bf16 %v644_v43, %v636_v42  ;;  %v664_v42 = vld [vmem:[%s1822_s4 + $0x1e0] sm:$0xff] }
  0x8b   :  { %1243 = vmatpush1.bf16.msra.mxu0 %v1242_v52  ;;  %v1328_v52 = vpack.c.bf16 %v661_v47, %v653_v46 }
  0x8c   :  { %1307 = vmatpush1.bf16.msra.mxu1 %v1306_v16  ;;  %1245 = vmatprep.subr.bf16.mxu0 %v1244_v53  ;;  %v660_v16 = vld [vmem:[%s1822_s4 + $0x1c0] sm:$0xff]  ;;  %v654_v53 = vld [vmem:[%s1822_s4 + $0x190] sm:$0xff] }
  0x8d   :  { %1309 = vmatprep.subr.bf16.mxu1 %v1308_v57  ;;  %v617_v57 = vld [vmem:[%s1822_s4 + $0x68] sm:$0xff] }
  0x8e   :  { %v1348_v62 = vpack.c.bf16 %v617_v57, %v609_v56 }
  0x8f   :  { %1247 = vmatpush1.bf16.msra.mxu0 %v1246_v63  ;;  %v608_v63 = vld [vmem:[%s1822_s4 + $0x20] sm:$0xff] }
  0x90   :  { %1311 = vmatpush1.bf16.msra.mxu1 %v1310_v0  ;;  %1249 = vmatprep.subr.bf16.mxu0 %v1248_v1  ;;  %v616_v0 = vld [vmem:[%s1822_s4 + $0x60] sm:$0xff]  ;;  %v1364_v1 = vpack.c.bf16 %v619_v59, %v611_v58 }
  0x91   :  { %1313 = vmatprep.subr.bf16.mxu1 %v1312_v5  ;;  %v633_v5 = vld [vmem:[%s1822_s4 + $0xe8] sm:$0xff]  ;;  %v1350_v7 = vpack.c.bf16 %v616_v0, %v608_v63  ;;  %v986_v63 = vld [vmem:[%s1818_s0 + $0x18] sm:$0xff] }
  0x92   :  { %v1352_v18 = vpack.c.bf16 %v633_v5, %v625_v4 }
  0x93   :  { %1251 = vmatpush1.bf16.msra.mxu0 %v1250_v11  ;;  %v624_v11 = vld [vmem:[%s1822_s4 + $0xa0] sm:$0xff] }
  0x94   :  { %1315 = vmatpush1.bf16.msra.mxu1 %v1314_v12  ;;  %1317 = vmatprep.subr.bf16.mxu0 %v1316_v14  ;;  %v632_v12 = vld [vmem:[%s1822_s4 + $0xe0] sm:$0xff]  ;;  %v626_v14 = vld [vmem:[%s1822_s4 + $0xb0] sm:$0xff] }
  0x95   :  { %1333 = vmatprep.subr.bf16.mxu1 %v1332_v21  ;;  %v649_v21 = vld [vmem:[%s1822_s4 + $0x168] sm:$0xff]  ;;  %v1354_v26 = vpack.c.bf16 %v632_v12, %v624_v11  ;;  %v994_v11 = vld [vmem:[%s1818_s0 + $0x58] sm:$0xff] }
  0x96   :  { %513 = vmatmul.mubr.f32.vlgmr.msra.gmra.mrb[4].mxu0 %v1464_v15 }
  0x97   :  { %590 = vmatmul.mubr.f32.vlgmr.msra.gmra.mrb[4].mxu1 %v1464_v15  ;;  %1319 = vmatpush1.bf16.msra.mxu0 %v1318_v27  ;;  %v1340_v15 = vpack.c.bf16 %v647_v38, %v639_v37  ;;  %v1370_v27 = vpack.c.bf16 %v634_v19, %v626_v14  ;;  %v667_v37 = vld [vmem:[%s1822_s4 + $0x1f8] sm:$0xff] }
  0x98   :  { %1335 = vmatpush1.bf16.msra.mxu1 %v1334_v28  ;;  %1321 = vmatprep.subr.bf16.mxu0 %v1320_v29  ;;  %v1356_v28 = vpack.c.bf16 %v649_v21, %v641_v20  ;;  %v640_v29 = vld [vmem:[%s1822_s4 + $0x120] sm:$0xff]  ;;  %v1376_v43 = vpack.c.bf16 %v667_v37, %v659_v36 }
  0x99   :  { %1337 = vmatprep.subr.bf16.mxu1 %v1336_v33  ;;  %518 = vmatprep.mubr.f32.mxu0 %v1471_v13  ;;  %v650_v33 = vld [vmem:[%s1822_s4 + $0x170] sm:$0xff]  ;;  %v1358_v38 = vpack.c.bf16 %v648_v30, %v640_v29 }
  0x9a   :  { %595 = vmatprep.mubr.f32.mxu1 %v1471_v13  ;;  %519 = vmatmul.mubr.f32.gmra.mrb[6].mxu0 %v1477_v17  ;;  %v652_v13 = vld [vmem:[%s1822_s4 + $0x180] sm:$0xff] }
  0x9b   :  { %1323 = vmatpush1.bf16.msra.mxu0 %v1322_v39  ;;  %596 = vmatmul.mubr.f32.gmra.mrb[6].mxu1 %v1477_v17  ;;  %v662_v17 = vld [vmem:[%s1822_s4 + $0x1d0] sm:$0xff]  ;;  %v1330_v60 = vpack.c.bf16 %v660_v16, %v652_v13  ;;  %v1374_v39 = vpack.c.bf16 %v650_v33, %v642_v31 }
  0x9c   :  { %1339 = vmatpush1.bf16.msra.mxu1 %v1338_v40  ;;  %1325 = vmatprep.subr.bf16.mxu0 %v1324_v41  ;;  %v1346_v61 = vpack.c.bf16 %v662_v17, %v654_v53  ;;  %v1360_v40 = vpack.c.bf16 %v665_v35, %v657_v34  ;;  %v656_v41 = vld [vmem:[%s1822_s4 + $0x1a0] sm:$0xff]  ;;  %v989_v33 = vld [vmem:[%s1818_s0 + $0x30] sm:$0xff]  ;;  %v988_v34 = vld [vmem:[%s1818_s0 + $0x28] sm:$0xff] }
  0x9d   :  { %1341 = vmatprep.subr.bf16.mxu1 %v1340_v15  ;;  %739 = vmatprep.mubr.f32.mxu0 %v1411_v55  ;;  %v666_v15 = vld [vmem:[%s1822_s4 + $0x1f0] sm:$0xff]  ;;  %v1362_v45 = vpack.c.bf16 %v664_v42, %v656_v41  ;;  %v990_v35 = vld [vmem:[%s1818_s0 + $0x38] sm:$0xff] }
  0x9e   :  { %816 = vmatprep.mubr.f32.mxu1 %v1411_v55  ;;  %v1378_v46 = vpack.c.bf16 %v666_v15, %v658_v44  ;;  %v997_v42 = vld [vmem:[%s1818_s0 + $0x70] sm:$0xff] }
  0x9f   :  { %1327 = vmatpush1.bf16.msra.mxu0 %v1326_v50 }
  0xa0   :  { %1343 = vmatpush1.bf16.msra.mxu1 %v1342_v51  ;;  %1329 = vmatprep.subr.bf16.mxu0 %v1328_v52 }
  0xa1   :  { %1345 = vmatprep.subr.bf16.mxu1 %v1344_v54 }
  0xa3   :  { %1331 = vmatpush1.bf16.msra.mxu0 %v1330_v60  ;;  %v983_v60 = vld [vmem:[%s1818_s0] sm:$0xff] }
  0xa4   :  { %1347 = vmatpush1.bf16.msra.mxu1 %v1346_v61  ;;  %1349 = vmatprep.subr.bf16.mxu0 %v1348_v62  ;;  %v985_v61 = vld [vmem:[%s1818_s0 + $0x10] sm:$0xff]  ;;  %v984_v62 = vld [vmem:[%s1818_s0 + $0x8] sm:$0xff] }
  0xa5   :  { %1365 = vmatprep.subr.bf16.mxu1 %v1364_v1 }
  0xa6   :  { %1052 = vmatmul.mubr.msk.f32.vlgmr.msra.gmra.mrb[8].mxu0 %vm668_vm0, %v1621_v6 }
  0xa7   :  { %1054 = vmatmul.mubr.msk.f32.vlgmr.msra.gmra.mrb[8].mxu1 %vm668_vm0, %v1621_v6  ;;  %1351 = vmatpush1.bf16.msra.mxu0 %v1350_v7  ;;  %v992_v7 = vld [vmem:[%s1818_s0 + $0x48] sm:$0xff] }
  0xa8   :  { %1367 = vmatpush1.bf16.msra.mxu1 %v1366_v10  ;;  %745 = vmatprep.mubr.f32.mxu0 %v1411_v55 }
  0xa9   :  { %822 = vmatprep.mubr.f32.mxu1 %v1411_v55  ;;  %1353 = vmatprep.subr.bf16.mxu0 %v1352_v18 }
  0xaa   :  { %1053 = vmatmul.mubr.msk.f32.gmra.mrb[10].mxu0 %vm668_vm0, %v603_v25  ;;  %1369 = vmatprep.subr.bf16.mxu1 %v1368_v22 }
  0xab   :  { %1055 = vmatmul.mubr.msk.f32.gmra.mrb[10].mxu1 %vm668_vm0, %v603_v25  ;;  %1355 = vmatpush1.bf16.msra.mxu0 %v1354_v26 }
  0xac   :  { %1371 = vmatpush1.bf16.msra.mxu1 %v1370_v27  ;;  %1357 = vmatprep.subr.bf16.mxu0 %v1356_v28 }
  0xad   :  { %1373 = vmatprep.subr.bf16.mxu1 %v1372_v32  ;;  %893 = vmatprep.mubr.f32.mxu0 %v1411_v55  ;;  %v987_v32 = vld [vmem:[%s1818_s0 + $0x20] sm:$0xff] }
  0xae   :  { %970 = vmatprep.mubr.f32.mxu1 %v1411_v55 }
  0xaf   :  { %1359 = vmatpush1.bf16.msra.mxu0 %v1358_v38 }
  0xb0   :  { %1375 = vmatpush1.bf16.msra.mxu1 %v1374_v39  ;;  %1361 = vmatprep.subr.bf16.mxu0 %v1360_v40  ;;  %v995_v39 = vld [vmem:[%s1818_s0 + $0x60] sm:$0xff] }
  0xb1   :  { %1377 = vmatprep.subr.bf16.mxu1 %v1376_v43  ;;  %v996_v43 = vld [vmem:[%s1818_s0 + $0x68] sm:$0xff] }
  0xb3   :  { %1363 = vmatpush1.bf16.msra.mxu0 %v1362_v45 }
  0xb4   :  { %1379 = vmatpush1.bf16.msra.mxu1 %v1378_v46  ;;  %v998_v46 = vld [vmem:[%s1818_s0 + $0x78] sm:$0xff] }
  0xb6   :  { %1056 = vmatmul.mubr.msk.f32.vlgmr.msra.gmra.mrb[12].mxu0 %vm668_vm0, %v1621_v6 }
  0xb7   :  { %1058 = vmatmul.mubr.msk.f32.vlgmr.msra.gmra.mrb[12].mxu1 %vm668_vm0, %v1621_v6  ;;  %899 = vmatprep.mubr.f32.mxu0 %v1411_v55  ;;  %v993_v6 = vld [vmem:[%s1818_s0 + $0x50] sm:$0xff] }
  0xb8   :  { %976 = vmatprep.mubr.f32.mxu1 %v1411_v55 }
  0xba   :  { %1057 = vmatmul.mubr.msk.f32.gmra.mrb[14].mxu0 %vm668_vm0, %v603_v25 }
  0xbb   :  { %1059 = vmatmul.mubr.msk.f32.gmra.mrb[14].mxu1 %vm668_vm0, %v603_v25 }
 0x129   :  { %v360_v47 = vpop.f32.mrb[0].mxu0 }
 0x12a   :  { %v437_v48 = vpop.f32.mrb[0].mxu1  ;;  %v362_v49 = vpop.f32.mrb[1].mxu0  ;;  %v999_v0 = vmul.f32 %v983_v60, %v360_v47 }
 0x12b   :  { %v439_v50 = vpop.f32.mrb[1].mxu1  ;;  %v1001_v1 = vmul.f32 %v985_v61, %v437_v48  ;;  %v1000_v2 = vmul.f32 %v984_v62, %v362_v49 }
 0x12c   :  { %v1002_v5 = vmul.f32 %v986_v63, %v439_v50 }
 0x12d   :  { %v366_v51 = vpop.f32.mrb[2].mxu0 }
 0x12e   :  { %v443_v52 = vpop.f32.mrb[2].mxu1  ;;  %v368_v13 = vpop.f32.mrb[3].mxu0  ;;  %v1007_v19 = vmul.f32 %v991_v3, %v366_v51 }
 0x12f   :  { %v445_v16 = vpop.f32.mrb[3].mxu1  ;;  %v1009_v21 = vmul.f32 %v993_v6, %v443_v52  ;;  %v1008_v22 = vmul.f32 %v992_v7, %v368_v13 }
 0x130   :  { %v1010_v24 = vmul.f32 %v994_v11, %v445_v16 }
 0x169   :  { %v514_v53 = vpop.f32.mrb[4].mxu0 }
 0x16a   :  { %v591_v54 = vpop.f32.mrb[4].mxu1  ;;  %v516_v17 = vpop.f32.mrb[5].mxu0  ;;  %v1003_v36 = vmul.f32 %v987_v32, %v514_v53 }
 0x16b   :  { %v593_v56 = vpop.f32.mrb[5].mxu1  ;;  %v1005_v37 = vmul.f32 %v989_v33, %v591_v54  ;;  %v1004_v38 = vmul.f32 %v988_v34, %v516_v17 }
 0x16c   :  { %v1006_v41 = vmul.f32 %v990_v35, %v593_v56 }
 0x16d   :  { %v1710_v57 = vpop.f32.mrb[6].mxu0 }
 0x16e   :  { %v1712_v58 = vpop.f32.mrb[6].mxu1  ;;  %v1714_v55 = vpop.f32.mrb[7].mxu0  ;;  %v1011_v50 = vmul.f32 %v995_v39, %v1710_v57 }
 0x16f   :  { %v1716_v59 = vpop.f32.mrb[7].mxu1  ;;  %v1013_v52 = vmul.f32 %v997_v42, %v1712_v58  ;;  %v1012_v13 = vmul.f32 %v996_v43, %v1714_v55 }
 0x170   :  { %v1014_v53 = vmul.f32 %v998_v46, %v1716_v59 }
 0x179   :  { %v741_v4 = vpop.f32.mrb[8].mxu0 }
 0x17a   :  { %v1015_v8 = vmul.f32 %v999_v0, %v741_v4  ;;  %v818_v9 = vpop.f32.mrb[8].mxu1  ;;  %v743_v10 = vpop.f32.mrb[9].mxu0 }
 0x17b   :  { %v1017_v12 = vmul.f32 %v1001_v1, %v818_v9  ;;  %v1016_v14 = vmul.f32 %v1000_v2, %v743_v10  ;;  %v820_v18 = vpop.f32.mrb[9].mxu1 }
 0x17c   :  { %1031 = vst [vmem:[%s1823_s5] sm:$0xff] %v1015_v8  ;;  %v1018_v20 = vmul.f32 %v1002_v5, %v820_v18 }
 0x17d   :  { %1033 = vst [vmem:[%s1823_s5 + $0x10] sm:$0xff] %v1017_v12  ;;  %1032 = vst [vmem:[%s1823_s5 + $0x8] sm:$0xff] %v1016_v14  ;;  %v747_v23 = vpop.f32.mrb[10].mxu0 }
 0x17e   :  { %1034 = vst [vmem:[%s1823_s5 + $0x18] sm:$0xff] %v1018_v20  ;;  %v1023_v25 = vmul.f32 %v1007_v19, %v747_v23  ;;  %v824_v26 = vpop.f32.mrb[10].mxu1  ;;  %v749_v27 = vpop.f32.mrb[11].mxu0 }
 0x17f   :  { %v1025_v28 = vmul.f32 %v1009_v21, %v824_v26  ;;  %v1024_v29 = vmul.f32 %v1008_v22, %v749_v27  ;;  %v826_v30 = vpop.f32.mrb[11].mxu1 }
 0x180   :  { %1039 = vst [vmem:[%s1823_s5 + $0x40] sm:$0xff] %v1023_v25  ;;  %v1026_v31 = vmul.f32 %v1010_v24, %v826_v30 }
 0x181   :  { %1041 = vst [vmem:[%s1823_s5 + $0x50] sm:$0xff] %v1025_v28  ;;  %1040 = vst [vmem:[%s1823_s5 + $0x48] sm:$0xff] %v1024_v29 }
 0x182   :  { %1042 = vst [vmem:[%s1823_s5 + $0x58] sm:$0xff] %v1026_v31 }
 0x189   :  { %v895_v40 = vpop.f32.mrb[12].mxu0 }
 0x18a   :  { %v1019_v44 = vmul.f32 %v1003_v36, %v895_v40  ;;  %v972_v15 = vpop.f32.mrb[12].mxu1  ;;  %v897_v45 = vpop.f32.mrb[13].mxu0 }
 0x18b   :  { %v1021_v47 = vmul.f32 %v1005_v37, %v972_v15  ;;  %v1020_v48 = vmul.f32 %v1004_v38, %v897_v45  ;;  %v974_v49 = vpop.f32.mrb[13].mxu1 }
 0x18c   :  { %1035 = vst [vmem:[%s1823_s5 + $0x20] sm:$0xff] %v1019_v44  ;;  %v1022_v51 = vmul.f32 %v1006_v41, %v974_v49 }
 0x18d   :  { %1037 = vst [vmem:[%s1823_s5 + $0x30] sm:$0xff] %v1021_v47  ;;  %1036 = vst [vmem:[%s1823_s5 + $0x28] sm:$0xff] %v1020_v48  ;;  %v901_v16 = vpop.f32.mrb[14].mxu0 }
 0x18e   :  { %1038 = vst [vmem:[%s1823_s5 + $0x38] sm:$0xff] %v1022_v51  ;;  %v1027_v54 = vmul.f32 %v1011_v50, %v901_v16  ;;  %v978_v17 = vpop.f32.mrb[14].mxu1  ;;  %v903_v56 = vpop.f32.mrb[15].mxu0 }
 0x18f   :  { %v1029_v57 = vmul.f32 %v1013_v52, %v978_v17  ;;  %v1028_v58 = vmul.f32 %v1012_v13, %v903_v56  ;;  %v980_v55 = vpop.f32.mrb[15].mxu1 }
 0x190   :  { %1043 = vst [vmem:[%s1823_s5 + $0x60] sm:$0xff] %v1027_v54  ;;  %v1030_v60 = vmul.f32 %v1014_v53, %v980_v55 }
 0x191   :  { %1045 = vst [vmem:[%s1823_s5 + $0x70] sm:$0xff] %v1029_v57  ;;  %1044 = vst [vmem:[%s1823_s5 + $0x68] sm:$0xff] %v1028_v58 }
 0x192   :  { %1046 = vst [vmem:[%s1823_s5 + $0x78] sm:$0xff] %v1030_v60 }
 0x193   :  { %1051 = vsyncpa [#allocation3], 1 }

</bundles_post_ra>
